<compile_context>
chip_gen: v7x
topology: tpu7x:2x2x1
jax: 0.10.0
libtpu: 0.0.40
codegen_flags: <defaults>
</compile_context>

<pallas_src>
import functools
import math

import jax
import jax.numpy as jnp
from jax.experimental import pallas as pl
from jax.experimental.pallas import tpu as pltpu


PRIMITIVES = [
    'none',
    'identity',
    'mbconv_3_3',
    'mbconv_3_5',
    'mbconv_6_3',
    'mbconv_6_5',
    'mbconv_6_7',
]


# -----------------------------------------------------------------------------
# Pallas kernel: tiled, fused cross-entropy + pre-folded latency scale
# -----------------------------------------------------------------------------
def _ce_latency_kernel(target_ref, logits_ref, out_ref, acc_ref, *,
                       scale_over_n, tile_n, n_total):
    # logits_ref : (tile_n, C) native dtype (batch on sublanes, class dim on lanes)
    # target_ref : (tile_n, 1) int32
    # out_ref    : (1, 1) f32 (same block for every grid step -> resident)
    # acc_ref    : (1, 1) f32 VMEM scratch accumulator
    i = pl.program_id(0)

    @pl.when(i == 0)
    def _init():
        acc_ref[...] = jnp.zeros_like(acc_ref)

    logits = logits_ref[...].astype(jnp.float32)                          # (tn, C)
    tn, c = logits.shape

    # stable log-sum-exp per row
    m = jnp.max(logits, axis=-1, keepdims=True)                           # (tn, 1)
    lse = jnp.log(jnp.sum(jnp.exp(logits - m), axis=-1, keepdims=True)) + m

    # gather logits[r, target[r]] via one-hot built from an iota compare
    col = jax.lax.broadcasted_iota(jnp.int32, (tn, c), 1)
    onehot = (col == target_ref[...]).astype(jnp.float32)                 # (tn, C)
    picked = jnp.sum(logits * onehot, axis=-1, keepdims=True)             # (tn, 1)

    # mask rows past the true batch size (last partial tile reads undefined padding)
    row = jax.lax.broadcasted_iota(jnp.int32, (tn, 1), 0) + i * tile_n
    delta = jnp.where(row < n_total, lse - picked, jnp.float32(0.0))      # (tn, 1)

    acc_ref[...] += jnp.sum(delta, axis=0, keepdims=True)                 # (1, 1)

    @pl.when(i == pl.num_programs(0) - 1)
    def _finalize():
        # scale_over_n == alpha * beta * log(latency) / N, folded on the host in float64
        out_ref[...] = acc_ref[...] * jnp.float32(scale_over_n)


def _choose_tile_n(n, c):
    """Pick a batch tile: ~4 MiB per logits tile so the double-buffered working set
    (~8 MiB) fits the default scoped VMEM on every TPU generation (v5e 16, v6e/v7x 32 MiB)."""
    budget_bytes = 4 * 1024 * 1024
    t = budget_bytes // max(c * 4, 1)
    t = max(8, min(t, 1024))
    t = (t // 8) * 8
    if t >= n:
        return n            # single full-batch block (block shape == full array dims is always legal)
    return t


def fused_ce_latency_loss(out_logits, target, latency, *, alpha, beta, tile_n=None):
    """Fused cross-entropy + latency-loss kernel. Returns a scalar f32."""
    n, c = out_logits.shape

    # Host-side constant folding in double precision:
    #   log(latency ** beta) == beta * log(latency)   for latency > 0
    latency = float(latency)
    if latency > 0.0:
        log_term = float(beta) * math.log(latency)
    else:
        log_term = float('-inf')   # mirrors torch.log(0 ** beta) == -inf hazard in the original
    scale_over_n = float(alpha) * log_term / float(n)

    if tile_n is None:
        tile_n = _choose_tile_n(n, c)
    else:
        tile_n = n if tile_n >= n else max(8, (int(tile_n) // 8) * 8)

    grid = (pl.cdiv(n, tile_n),)
    target_2d = jnp.asarray(target, dtype=jnp.int32).reshape(n, 1)

    kernel = functools.partial(_ce_latency_kernel,
                               scale_over_n=scale_over_n,
                               tile_n=tile_n,
                               n_total=n)

    result = pl.pallas_call(
        kernel,
        out_shape=jax.ShapeDtypeStruct((1, 1), jnp.float32),
        grid_spec=pltpu.PrefetchScalarGridSpec(
            num_scalar_prefetch=0,
            grid=grid,
            in_specs=[
                pl.BlockSpec((tile_n, 1), lambda i: (i, 0)),   # targets  (tile_n, 1) int32
                pl.BlockSpec((tile_n, c), lambda i: (i, 0)),   # logits   (tile_n, C) native dtype
            ],
            out_specs=pl.BlockSpec((1, 1), lambda i: (0, 0)),  # resident scalar accumulator target
            scratch_shapes=[pltpu.VMEM((1, 1), jnp.float32)],
        ),
        compiler_params=pltpu.CompilerParams(
            dimension_semantics=("arbitrary",),
            vmem_limit_bytes=32 * 1024 * 1024,
        ),
    )(target_2d, out_logits)
    return result[0, 0]


# -----------------------------------------------------------------------------
# Module wrapper (host-side latency predictor + fused kernel call)
# -----------------------------------------------------------------------------
class FBNetLatencyLoss:
    """JAX/Pallas port of the PyTorch FBNetLatencyLoss module."""

    def __init__(self, alpha, beta, channels, strides, input_size=112):
        self.channels = channels
        self.strides = strides
        self.alpha = alpha
        self.beta = alpha  # NB: reproduces the original module bug (beta argument ignored)
        self._calculate_feature_map_size(input_size)
        self._load_latency()

    def _load_latency(self):
        # TODO(synk): original reads '../proxylessnas_new/latency.csv'; replaced here by a
        # deterministic synthetic latency table (no file I/O allowed in this script).
        self._latency = {}

    def _calculate_feature_map_size(self, input_size):
        self.feature_maps = [input_size]
        for s in self.strides[:-1]:
            input_size = input_size // s
            self.feature_maps.append(input_size)

    def _predictor(self, inputs):
        """predict latency. input example: mbconv_6_3_80_80_14_1"""
        div = inputs.split('_')
        if div[0] == 'identity' or div[0] == 'none':
            div.insert(1, 0)
            div.insert(2, 0)
        op, exp_rate, ksize, c_in, c_out, size, stride = div
        if op == 'identity' or op == 'none':
            return 0
        out_size = int(size) // int(stride)
        findstr = '{}x{}x{}-{}x{}x{}-expand:{}-kernel:{}-stride:{}'.format(
            size, size, c_in, out_size, out_size, c_out, exp_rate, ksize, stride)
        if self._latency.get(findstr) is None:
            # deterministic synthetic latency standing in for the CSV entry
            self._latency[findstr] = (int(exp_rate) * int(ksize) ** 2 * int(c_in)
                                      * int(c_out) * int(size)) / (int(stride) * 1.0e5)
        return float(self._latency[findstr])

    def compute_latency(self, selecteds, alphas):
        # NOTE: the original forward computes F.softmax(alphas[i]) but never uses the result
        # for the latency sum; the device softmax + host transfer is dropped here to avoid a
        # host<->device sync on every forward (pure dead code, semantics unchanged).
        del alphas
        latency = 0.0
        for i, selected in enumerate(selecteds):
            c_in = self.channels[i]
            c_out = self.channels[i + 1]
            fm = self.feature_maps[i]
            strides = self.strides[i]
            op_names = [PRIMITIVES[j] for j in selected]
            latency += sum(
                self._predictor('{}_{}_{}_{}_{}'.format(op, c_in, c_out, fm, strides))
                for op in op_names)
        return latency

    def forward(self, target, out, selecteds, alphas):
        latency = self.compute_latency(selecteds, alphas)
        return fused_ce_latency_loss(out, target, latency,
                                     alpha=self.alpha, beta=self.beta)


if __name__ == "__main__":
    key = jax.random.PRNGKey(0)
    k_logits, k_target, k2_logits, k2_target = jax.random.split(key, 4)

    channels = [16, 24, 32, 64]                        # len = n_layers + 1
    strides = [1, 2, 2]                                # len = n_layers
    selecteds = [[2, 4, 1], [3, 5, 0], [2, 6, 4]]      # chosen primitive indices per layer
    alphas = [jnp.zeros((len(PRIMITIVES),), jnp.float32) for _ in selecteds]

    module = FBNetLatencyLoss(alpha=0.2, beta=0.6, channels=channels,
                              strides=strides, input_size=112)
    latency = module.compute_latency(selecteds, alphas)

    def reference_loss(logits, tgt):
        log_probs = jax.nn.log_softmax(logits.astype(jnp.float32), axis=-1)
        n = logits.shape[0]
        ce = -jnp.mean(log_probs[jnp.arange(n), tgt])
        return module.alpha * ce * jnp.log(jnp.float32(latency) ** module.beta)

    # --- Case 1: small demo shape, single-block path --------------------------------
    N, C = 8, 16
    out = jax.random.normal(k_logits, (N, C), jnp.float32)
    target = jax.random.randint(k_target, (N,), 0, C, jnp.int32)

    loss = jax.block_until_ready(module.forward(target, out, selecteds, alphas))
    ref = reference_loss(out, target)
    assert jnp.allclose(loss, ref, rtol=1e-5, atol=1e-5), (loss, ref)

    # --- Case 2: batch-tiled path with a partial last tile (exercises grid + masking) -
    N2, C2 = 40, 16
    out2 = jax.random.normal(k2_logits, (N2, C2), jnp.float32)
    target2 = jax.random.randint(k2_target, (N2,), 0, C2, jnp.int32)

    loss2 = jax.block_until_ready(
        fused_ce_latency_loss(out2, target2, latency,
                              alpha=module.alpha, beta=module.beta, tile_n=16))
    ref2 = reference_loss(out2, target2)
    assert jnp.allclose(loss2, ref2, rtol=1e-5, atol=1e-5), (loss2, ref2)

    print("KERNEL_OK")
</pallas_src>

<mosaic_0001>
module attributes {stable_mosaic.version = 11 : i64} {
  func.func @_ce_latency_kernel(%arg0: i32, %arg1: memref<8x1xi32, #tpu.memory_space<vmem>>, %arg2: memref<8x16xf32, #tpu.memory_space<vmem>>, %arg3: memref<1x1xf32, #tpu.memory_space<vmem>>, %arg4: memref<1x1xf32, #tpu.memory_space<vmem>>) attributes {dimension_semantics = [#tpu.dimension_semantics<arbitrary>], iteration_bounds = array<i64: 1>, scalar_prefetch = 0 : i64, scratch_operands = 1 : i64, tpu.core_type = #tpu.core_type<tc>, window_params = [{transform_indices = @transform_0, window_bounds = array<i64: 8, 1>}, {transform_indices = @transform_1, window_bounds = array<i64: 8, 16>}, {pipeline_mode = #tpu.pipeline_mode<synchronous>, transform_indices = @transform_2, window_bounds = array<i64: 1, 1>}]} {
    %c0_i32 = arith.constant 0 : i32
    %0 = arith.cmpi eq, %arg0, %c0_i32 : i32
    %1 = arith.extui %0 : i1 to i32
    %c0_i32_0 = arith.constant 0 : i32
    %2 = arith.cmpi ne, %1, %c0_i32_0 : i32
    scf.if %2 {
      %cst_15 = arith.constant 0.000000e+00 : f32
      %39 = vector.broadcast %cst_15 : f32 to vector<1x1xf32>
      %c0_16 = arith.constant 0 : index
      %c0_17 = arith.constant 0 : index
      %40 = vector.load %arg4[%c0_16, %c0_17] : memref<1x1xf32, #tpu.memory_space<vmem>>, vector<1x1xf32>
      tpu.vector_store %arg4[%c0_16, %c0_17], %39 {strides = array<i32>} : memref<1x1xf32, #tpu.memory_space<vmem>>, vector<1x1xf32>,
    } else {
    }
    %c0 = arith.constant 0 : index
    %c0_1 = arith.constant 0 : index
    %3 = vector.load %arg2[%c0, %c0_1] : memref<8x16xf32, #tpu.memory_space<vmem>>, vector<8x16xf32>
    %cst = arith.constant dense<0xFF800000> : vector<8xf32>
    %4 = vector.multi_reduction <maximumf>, %3, %cst [1] : vector<8x16xf32> to vector<8xf32>
    %5 = vector.shape_cast %4 : vector<8xf32> to vector<8x1xf32>
    %6 = vector.broadcast %5 : vector<8x1xf32> to vector<8x16xf32>
    %7 = arith.subf %3, %6 : vector<8x16xf32>
    %8 = math.exp %7 : vector<8x16xf32>
    %cst_2 = arith.constant dense<0.000000e+00> : vector<8xf32>
    %9 = vector.multi_reduction <add>, %8, %cst_2 [1] : vector<8x16xf32> to vector<8xf32>
    %10 = vector.shape_cast %9 : vector<8xf32> to vector<8x1xf32>
    %11 = math.log %10 : vector<8x1xf32>
    %12 = arith.addf %11, %5 : vector<8x1xf32>
    %13 = tpu.iota {dimensions = array<i32: 1>} : vector<8x16xi32>
    %c0_3 = arith.constant 0 : index
    %c0_4 = arith.constant 0 : index
    %14 = vector.load %arg1[%c0_3, %c0_4] : memref<8x1xi32, #tpu.memory_space<vmem>>, vector<8x1xi32>
    %15 = vector.broadcast %14 : vector<8x1xi32> to vector<8x16xi32>
    %16 = arith.cmpi eq, %13, %15 : vector<8x16xi32>
    %17 = arith.extui %16 : vector<8x16xi1> to vector<8x16xi32>
    %18 = arith.sitofp %17 : vector<8x16xi32> to vector<8x16xf32>
    %19 = arith.mulf %3, %18 : vector<8x16xf32>
    %cst_5 = arith.constant dense<0.000000e+00> : vector<8xf32>
    %20 = vector.multi_reduction <add>, %19, %cst_5 [1] : vector<8x16xf32> to vector<8xf32>
    %21 = vector.shape_cast %20 : vector<8xf32> to vector<8x1xf32>
    %22 = tpu.iota {dimensions = array<i32: 0>} : vector<8x1xi32>
    %c8_i32 = arith.constant 8 : i32
    %23 = arith.muli %arg0, %c8_i32 : i32
    %24 = vector.broadcast %23 : i32 to vector<8x1xi32>
    %25 = arith.addi %22, %24 : vector<8x1xi32>
    %c8_i32_6 = arith.constant 8 : i32
    %26 = vector.broadcast %c8_i32_6 : i32 to vector<8x1xi32>
    %27 = arith.cmpi slt, %25, %26 : vector<8x1xi32>
    %28 = arith.subf %12, %21 : vector<8x1xf32>
    %cst_7 = arith.constant 0.000000e+00 : f32
    %29 = vector.broadcast %cst_7 : f32 to vector<8x1xf32>
    %30 = arith.select %27, %28, %29 : vector<8x1xi1>, vector<8x1xf32>
    %c0_8 = arith.constant 0 : index
    %c0_9 = arith.constant 0 : index
    %31 = vector.load %arg4[%c0_8, %c0_9] : memref<1x1xf32, #tpu.memory_space<vmem>>, vector<1x1xf32>
    %cst_10 = arith.constant dense<0.000000e+00> : vector<1xf32>
    %32 = vector.multi_reduction <add>, %30, %cst_10 [0] : vector<8x1xf32> to vector<1xf32>
    %33 = vector.shape_cast %32 : vector<1xf32> to vector<1x1xf32>
    %34 = arith.addf %31, %33 : vector<1x1xf32>
    %c0_11 = arith.constant 0 : index
    %c0_12 = arith.constant 0 : index
    %35 = vector.load %arg4[%c0_11, %c0_12] : memref<1x1xf32, #tpu.memory_space<vmem>>, vector<1x1xf32>
    tpu.vector_store %arg4[%c0_11, %c0_12], %34 {strides = array<i32>} : memref<1x1xf32, #tpu.memory_space<vmem>>, vector<1x1xf32>,
    %c0_i32_13 = arith.constant 0 : i32
    %36 = arith.cmpi eq, %arg0, %c0_i32_13 : i32
    %37 = arith.extui %36 : i1 to i32
    %c0_i32_14 = arith.constant 0 : i32
    %38 = arith.cmpi ne, %37, %c0_i32_14 : i32
    scf.if %38 {
      %c0_15 = arith.constant 0 : index
      %c0_16 = arith.constant 0 : index
      %39 = vector.load %arg4[%c0_15, %c0_16] : memref<1x1xf32, #tpu.memory_space<vmem>>, vector<1x1xf32>
      %cst_17 = arith.constant 0.0292414986 : f32
      %40 = vector.broadcast %cst_17 : f32 to vector<1x1xf32>
      %41 = arith.mulf %39, %40 : vector<1x1xf32>
      %c0_18 = arith.constant 0 : index
      %c0_19 = arith.constant 0 : index
      %42 = vector.load %arg3[%c0_18, %c0_19] : memref<1x1xf32, #tpu.memory_space<vmem>>, vector<1x1xf32>
      tpu.vector_store %arg3[%c0_18, %c0_19], %41 {strides = array<i32>} : memref<1x1xf32, #tpu.memory_space<vmem>>, vector<1x1xf32>,
    } else {
    }
    return
  }
  func.func @transform_0(%arg0: i32) -> (i32, i32) {
    %c0_i32 = arith.constant 0 : i32
    %c0_i32_0 = arith.constant 0 : i32
    return %arg0, %c0_i32 : i32, i32
  }
  func.func @transform_1(%arg0: i32) -> (i32, i32) {
    %c0_i32 = arith.constant 0 : i32
    %c0_i32_0 = arith.constant 0 : i32
    return %arg0, %c0_i32 : i32, i32
  }
  func.func @transform_2(%arg0: i32) -> (i32, i32) {
    %c0_i32 = arith.constant 0 : i32
    %c0_i32_0 = arith.constant 0 : i32
    %c0_i32_1 = arith.constant 0 : i32
    return %c0_i32, %c0_i32_0 : i32, i32
  }
}

</mosaic_0001>

<bundles_post_ra>
// kernel: tpu_custom_call.1
= control target key start
LH: loop header
LB: loop body
LE: loop exit
PB: predicated region body
PF: predicated region fallthrough
CT: control target
= control target key end

     0   :  { %vm19_vm0 = vcmask 130048   ;;  %s158_s0 = inlined_call_operand.vmem [shape: s32[8,1], index: 0, kind: input, shape index: {}]   ;;  %s159_s1 = inlined_call_operand.vmem [shape: f32[8,16], index: 1, kind: input, shape index: {}]   ;;  %s160_s2 = inlined_call_operand.hbm [shape: f32[1,1], index: 2, kind: output, shape index: {}]  }
   0x1   :  { %v18_v0 = vld [vmem:[%s159_s1] sm:$0xff] }
   0x2   :  { %7 = vsyncpa [#allocation4], 0  ;;  %v20_v1 = vsel %vm19_vm0, %v18_v0, -inf  ;;  %v116_v2 = vmov 0   ;;  %v34_v3 = vld [vmem:[%s158_s0] sm:$0xff]  ;;  %vm16_vm1 = vcmask 0   ;;  %v32_v7 = vlaneseq }
   0x3   :  { %87 = vset.pattern.permute.xlu0 %v116_v2  ;;  %v117_v4 = vmov 0.0   ;;  %s118_s0 = smov [#allocation3]  }
   0x4   :  { %21 = vmax.xlane.f32.xlu0 %v20_v1  ;;  %17 = vst.msk [vmem:[#allocation2] sm:$0x1] %vm16_vm1, %v117_v4  ;;  %v33_v9 = vand.u32 127, %v32_v7  ;;  %s75_s1 = sshll.u32 %s118_s0, 4  ;;  %s76_s1 = int_to_ptr.vmem [resolvable:$true] %s75_s1 }
   0x5   :  { %s92_s13 = scalar_lea.vmem %s76_s1, 16  ;;  %s96_s14 = scalar_lea.vmem %s76_s1, 32 }
   0x6   :  { %p93_p0 = scmp.ne.s32.totalorder %s76_s1, %s92_s13  ;;  %p97_p1 = scmp.lt.s32.totalorder %s76_s1, %s76_s1 }
   0x7   :  { %p98_p2 = scmp.lt.s32.totalorder %s96_s14, %s92_s13 }
   0x9   :  { %p99_p3 = por %p98_p2, %p97_p1 }
   0xb   :  { %v53_v27 = vld [vmem:[#allocation2] sm:$0x1]  ;;  %p100_p4 = pnand %p99_p3, %p93_p0 }
  0x1a   :  { %36 = vperm.xlu0 %87, %v34_v3  }
  0x91   :  { %v22_v5 = vpop.xlane.xlu0 %21 }
  0x92   :  { %v23_v6 = vsub.f32 %v18_v0, %v22_v5 }
  0x94   :  { %v24_v8 = vmul.f32 1.442695, %v23_v6 }
  0x96   :  { %88 = vpow2.f32 %v24_v8 }
  0x99   :  { %v37_v10 = vpop.permute.xlu0 %36 }
  0x9a   :  { %vm38_vm2 = vcmp.eq.s32.totalorder %v33_v9, %v37_v10 }
  0x9b   :  { %v83_v11 = vsel %vm38_vm2, 1.0, %v117_v4 }
  0x9c   :  { %v41_v12 = vmul.f32 %v83_v11, %v18_v0 }
  0x9e   :  { %v42_v15 = vsel %vm19_vm0, %v41_v12, 0.0 }
  0xa0   :  { %v89_v13 = vpop.eup %88 }
  0xa1   :  { %v26_v14 = vsel %vm19_vm0, %v89_v13, 0.0 }
  0xa2   :  { %27 = vadd.xlane.f32.xlu1 %v26_v14 }
  0xa6   :  { %43 = vadd.xlane.f32.xlu1 %v42_v15 }
 0x12f   :  { %v28_v16 = vpop.xlane.xlu1 %27 }
 0x130   :  { %90 = vlog2.f32 %v28_v16 }
 0x133   :  { %v44_v19 = vpop.xlane.xlu1 %43 }
 0x13a   :  { %v91_v17 = vpop.eup %90 }
 0x13b   :  { %v30_v18 = vmul.f32 0.6931472, %v91_v17 }
 0x13d   :  { %v31_v20 = vadd.f32 %v30_v18, %v22_v5 }
 0x13f   :  { %v51_v21 = vsub.f32 %v31_v20, %v44_v19 }
 0x141   :  { %v54_v22 = vrot.slane %v51_v21, 4 }
 0x143   :  { %v55_v23 = vadd.f32 %v54_v22, %v51_v21 }
 0x145   :  { %v56_v24 = vrot.slane %v55_v23, 2 }
 0x147   :  { %v57_v25 = vadd.f32 %v56_v24, %v55_v23 }
 0x149   :  { %v58_v26 = vrot.slane %v57_v25, 1 }
 0x14b   :  { %v59_v28 = vadd.f32 %v58_v26, %v57_v25 }
 0x14d   :  { %v60_v29 = vadd.f32 %v59_v28, %v53_v27 }
 0x14f   :  { %62 = vst.msk [vmem:[#allocation2] sm:$0x1] %vm16_vm1, %v60_v29 }
 0x156   :  { %v66_v30 = vld [vmem:[#allocation2] sm:$0x1] }
 0x157   :  { %v67_v31 = vmul.f32 0.029241499, %v66_v30 }
 0x159   :  { %68 = vst.msk [vmem:[#allocation3] sm:$0x1] %vm16_vm1, %v67_v31 }
 0x15a   :  { %103 = shalt.err (!%p100_p4)
}
 0x15b   :  { %s104_s17 = scalar_lea.hbm %s160_s2, 16 }
 0x15c   :  { %p105_p5 = scmp.ne.s32.totalorder %s160_s2, %s104_s17  ;;  %p108_p6 = scmp.lt.u32.totalorder %s104_s17, %s160_s2 }
 0x15e   :  { %p110_p7 = pnand %p108_p6, %p105_p5 }
 0x160   :  { %113 = shalt.err (!%p110_p7)
}
 0x161   :  { %78 = dma.vmem_to_hbm [thread:$0]  %s76_s1, 16, %s160_s2, [#allocation4]  }
 0x162   :  { %114 = dma.done.wait [#allocation4], 16  }
 0x163   :  { %115 = vsyncadd [#allocation4], 4294967280 }
 0x164   :  { %82 = vsyncpa [#allocation4], 1 }

</bundles_post_ra>
